<compile_context>
chip_gen: v7x
topology: tpu7x:2x2x1
jax: 0.10.0
libtpu: 0.0.40
codegen_flags: <defaults>
</compile_context>

<pallas_src>
import functools
import math

import jax
import jax.numpy as jnp
import numpy as np
from jax.experimental import pallas as pl
from jax.experimental.pallas import tpu as pltpu


# ------------------------------ model config -------------------------------

C_IN = 4
C_OUT_PER_IN = 2
HIDDEN_SIZE = 32
C_OFFSET = 0

EMBED_SIZE = min(max(1, int(HIDDEN_SIZE * 9.0 / 16.0 / (C_IN - 1))), 96)
HIDDEN_DIM_2 = HIDDEN_SIZE // 2

IN1 = 3 * (C_IN - 1)                       # in_to_features input dim   (9)
OUT1 = EMBED_SIZE * (C_IN - 1)             # in_to_features output dim  (18)
IN2 = HIDDEN_SIZE + OUT1                   # features_to_hidden input   (50)
OUT2 = HIDDEN_DIM_2 * C_IN                 # features_to_hidden output  (64)
OUT3 = C_OUT_PER_IN * C_IN                 # hidden_to_out output dim   (8)

PACK = 128 // OUT3                         # rows packed per lane-dense out row
PACKED_WIDTH = PACK * OUT3                 # = 128

SQRT_2_OVER_PI = math.sqrt(2.0 / math.pi)
INV_SQRT2 = 1.0 / math.sqrt(2.0)


# ------------------------------ mask creation ------------------------------

def create_masks():
    m1 = np.ones((OUT1, IN1), np.float32)
    for c in range(C_OFFSET, C_IN - 1):
        m1[: EMBED_SIZE * c, c * 3:(c + 1) * 3] = 0
        m1[EMBED_SIZE * (c + 1):, c * 3:(c + 1) * 3] = 0
        m1[EMBED_SIZE * c: EMBED_SIZE * (c + 1), : c * 3] = 0
        m1[EMBED_SIZE * c: EMBED_SIZE * (c + 1), (c + 1) * 3:] = 0

    m2 = np.ones((OUT2, IN2), np.float32)
    for c in range(C_IN):
        col0 = HIDDEN_SIZE + EMBED_SIZE * (C_OFFSET + max(0, c - C_OFFSET))
        m2[HIDDEN_DIM_2 * c: HIDDEN_DIM_2 * (c + 1), col0:] = 0

    m3 = np.ones((OUT3, OUT2), np.float32)
    for c in range(C_IN):
        m3[: C_OUT_PER_IN * c, HIDDEN_DIM_2 * c: HIDDEN_DIM_2 * (c + 1)] = 0
        m3[C_OUT_PER_IN * (c + 1):, HIDDEN_DIM_2 * c: HIDDEN_DIM_2 * (c + 1)] = 0
    return m1, m2, m3


# ------------------------------ parameter init -----------------------------

def init_params(key):
    """Deterministic nn.Linear-style init (uniform +-1/sqrt(fan_in)), masked.
    The module's in-place `_mask_layers()` is folded into the (pre-masked)
    parameters, which is equivalent for the forward pass."""
    ks = jax.random.split(key, 6)

    def linear(kw, kb, fan_in, fan_out):
        bound = 1.0 / math.sqrt(fan_in)
        w = jax.random.uniform(kw, (fan_out, fan_in), jnp.float32, -bound, bound)
        b = jax.random.uniform(kb, (fan_out,), jnp.float32, -bound, bound)
        return w, b

    w1, b1 = linear(ks[0], ks[1], IN1, OUT1)
    w2, b2 = linear(ks[2], ks[3], IN2, OUT2)
    w3, b3 = linear(ks[4], ks[5], OUT2, OUT3)

    m1, m2, m3 = create_masks()
    w1 = w1 * jnp.asarray(m1)
    w2 = w2 * jnp.asarray(m2)
    w3 = w3 * jnp.asarray(m3)
    return (w1, b1), (w2, b2), (w3, b3)


# -------------------- one-time kernel-ready parameter prep -----------------

def prepare_params(params):
    """Hoisted out of the per-call path:
    - permute layer-1 columns from the torch interleaving
      [x0, elu(x0), elu(-x0), x1, ...] to the kernel's block order
      [x..., elu(x)..., elu(-x)...],
    - split layer-2 weight into its `features` / `h1` column blocks (so the
      kernel avoids the 32-lane concat of h1),
    - transpose all weights so the kernel does plain `act @ W`,
    - reshape biases to (1, N)."""
    (w1, b1), (w2, b2), (w3, b3) = params
    f32 = jnp.float32
    w1t = jnp.concatenate([w1[:, 0::3], w1[:, 1::3], w1[:, 2::3]], axis=1).T   # (IN1, OUT1)
    w2ft = w2[:, :HIDDEN_SIZE].T                                               # (32, OUT2)
    w2ht = w2[:, HIDDEN_SIZE:].T                                               # (OUT1, OUT2)
    w3t = w3.T                                                                 # (OUT2, OUT3)
    return (w1t.astype(f32), b1.reshape(1, OUT1).astype(f32),
            w2ft.astype(f32), w2ht.astype(f32), b2.reshape(1, OUT2).astype(f32),
            w3t.astype(f32), b3.reshape(1, OUT3).astype(f32))


# ------------------------------ activations --------------------------------

def _gelu(v, approximate):
    if approximate:
        # tanh form: transcendental goes to the (otherwise idle) EUP slot.
        return 0.5 * v * (1.0 + jnp.tanh(SQRT_2_OVER_PI * (v + 0.044715 * v * v * v)))
    # exact erf form == PyTorch nn.GELU() default
    return 0.5 * v * (1.0 + jax.lax.erf(v * INV_SQRT2))


# ------------------------------ Pallas kernel ------------------------------

def autoreg_ff_kernel(x_ref, feat_ref,
                      w1t_ref, b1_ref, w2ft_ref, w2ht_ref, b2_ref,
                      w3t_ref, b3_ref, out_ref,
                      *, approximate_gelu, packed_out):
    # Drop the last input channel in-kernel (wrapper passes all c_in channels).
    x = x_ref[:, :C_IN - 1]                  # (bm, 3)
    feat = feat_ref[...]                     # (bm, 32)

    # elu(x) and elu(-x) from a single exp:  e = exp(-|x|) - 1
    e_m1 = jnp.exp(-jnp.abs(x)) - 1.0
    pos = x > 0
    elu_pos = jnp.where(pos, x, e_m1)        # elu(x)
    elu_neg = jnp.where(pos, e_m1, -x)       # elu(-x)

    # Layer 1: fused dot on [x | elu(x) | elu(-x)]   (bm, 9) @ (9, 18)
    xin = jnp.concatenate([x, elu_pos, elu_neg], axis=-1)
    h1 = jnp.dot(xin, w1t_ref[...], preferred_element_type=jnp.float32) + b1_ref[...]
    h1 = _gelu(h1, approximate_gelu)

    # Layer 2: split dot feat@W2a + h1@W2b   (avoids the 32-lane concat of h1)
    h2 = (jnp.dot(feat, w2ft_ref[...], preferred_element_type=jnp.float32)
          + jnp.dot(h1, w2ht_ref[...], preferred_element_type=jnp.float32)
          + b2_ref[...])
    h2 = _gelu(h2, approximate_gelu)

    # Layer 3:                                        (bm, 64) @ (64, 8)
    out = jnp.dot(h2, w3t_ref[...], preferred_element_type=jnp.float32) + b3_ref[...]

    if packed_out:
        # Lane-dense repack: 16 consecutive rows of 8 outputs -> one 128-lane
        # row.  Row-major, so the HBM-side (Bp//16,128)->(Bp,8) reshape is free.
        bm = out.shape[0]
        out_ref[...] = out.reshape(bm // PACK, PACKED_WIDTH).astype(out_ref.dtype)
    else:
        out_ref[...] = out.astype(out_ref.dtype)


# ------------------------------ call builder --------------------------------

def _round_up(n, m):
    return ((n + m - 1) // m) * m


@functools.lru_cache(maxsize=None)
def _build_autoreg_call(bm_eff, c_last, n_rows, grid_n, packed,
                        approximate_gelu, vmem_limit):
    if packed:
        out_rows = _round_up(n_rows, PACK) // PACK
        out_shape = jax.ShapeDtypeStruct((out_rows, PACKED_WIDTH), jnp.float32)
        out_spec = pl.BlockSpec((bm_eff // PACK, PACKED_WIDTH), lambda i: (i, 0))
    else:
        out_shape = jax.ShapeDtypeStruct((n_rows, OUT3), jnp.float32)
        out_spec = pl.BlockSpec((bm_eff, OUT3), lambda i: (i, 0))

    bcast = lambda i: (0, 0)
    cp_kwargs = dict(dimension_semantics=("parallel",))
    if vmem_limit is not None:
        cp_kwargs["vmem_limit_bytes"] = int(vmem_limit)

    return pl.pallas_call(
        functools.partial(autoreg_ff_kernel,
                          approximate_gelu=approximate_gelu,
                          packed_out=packed),
        out_shape=out_shape,
        grid=(grid_n,),
        in_specs=[
            pl.BlockSpec((bm_eff, c_last), lambda i: (i, 0)),       # inps (all channels)
            pl.BlockSpec((bm_eff, HIDDEN_SIZE), lambda i: (i, 0)),  # features
            pl.BlockSpec((IN1, OUT1), bcast),
            pl.BlockSpec((1, OUT1), bcast),
            pl.BlockSpec((HIDDEN_SIZE, OUT2), bcast),
            pl.BlockSpec((OUT1, OUT2), bcast),
            pl.BlockSpec((1, OUT2), bcast),
            pl.BlockSpec((OUT2, OUT3), bcast),
            pl.BlockSpec((1, OUT3), bcast),
        ],
        out_specs=out_spec,
        compiler_params=pltpu.CompilerParams(**cp_kwargs),
    )


# Tri-state cache for the lane-dense output layout (None=untested).
_LANE_DENSE_OK = [None]


# ------------------------------ wrapper -------------------------------------

def autoreg_feedforward(features, inps, prepared, *, bm=4096,
                        approximate_gelu=True, lane_dense_out=True):
    """prepared = prepare_params(params); bm is the batch tile (rows/grid step)."""
    lead = features.shape[:-1]
    assert inps.shape[:-1] == lead
    c_last = inps.shape[-1]
    assert c_last in (C_IN, C_IN - 1), c_last
    assert features.shape[-1] == HIDDEN_SIZE

    feat2d = features.reshape(-1, HIDDEN_SIZE).astype(jnp.float32)
    x2d = inps.reshape(-1, c_last).astype(jnp.float32)
    B = x2d.shape[0]

    # --- batch tile selection -------------------------------------------------
    # Small batches: one grid step (block == whole array).  Larger batches:
    # at least 2 grid steps (feed both v7x TensorCores), tile a multiple of 128
    # so the packed out block stays (8,128)-aligned, capped at `bm`.
    if B <= 256:
        bm_eff = _round_up(max(B, 1), PACK)
    else:
        bm_user = max(128, (int(bm) // 128) * 128)
        bm_eff = max(128, min(bm_user, _round_up(pl.cdiv(B, 2), 128)))
    grid_n = int(pl.cdiv(B, bm_eff))

    # --- VMEM limit ------------------------------------------------------------
    # Count double-buffered I/O blocks plus ~6 live lane-padded intermediates
    # (everything below 128 lanes pads to 128).  Clamp to physical VMEM
    # (v7x: 64 MiB) minus headroom.
    lane_bytes = bm_eff * 128 * 4
    est_vmem = 12 * lane_bytes + (1 << 20)
    vmem_limit = None
    if est_vmem > 10 * (1 << 20):
        phys = 64 << 20
        try:
            phys = int(pltpu.get_tpu_info().vmem_capacity_bytes)
        except Exception:
            pass
        cap = phys - (8 << 20)
        vmem_limit = int(min(cap, max(32 << 20, 2 * est_vmem)))

    args = (x2d, feat2d) + tuple(prepared)

    use_packed = (lane_dense_out and 128 % OUT3 == 0 and bm_eff % PACK == 0)
    if use_packed and _LANE_DENSE_OK[0] is not False:
        try:
            call = _build_autoreg_call(bm_eff, c_last, B, grid_n, True,
                                       bool(approximate_gelu), vmem_limit)
            out_p = call(*args)
            if _LANE_DENSE_OK[0] is None:
                jax.block_until_ready(out_p)   # one-time probe of the packed store
                _LANE_DENSE_OK[0] = True
            out2d = out_p.reshape(-1, OUT3)[:B]
            return out2d.reshape(lead + (OUT3,))
        except Exception:
            # In-kernel (bm,8)->(bm//16,128) relayout rejected by this Mosaic
            # version: fall back to the plain (bm,8) output layout.
            _LANE_DENSE_OK[0] = False

    call = _build_autoreg_call(bm_eff, c_last, B, grid_n, False,
                               bool(approximate_gelu), vmem_limit)
    out = call(*args)
    return out.reshape(lead + (OUT3,))


# ------------------------------ pure-JAX reference -------------------------

def reference(features, inps, params, *, approximate_gelu=True):
    (w1, b1), (w2, b2), (w3, b3) = params
    if inps.shape[-1] == C_IN:
        inps = inps[..., :-1]
    elu = lambda v: jnp.where(v > 0, v, jnp.exp(v) - 1.0)
    stacked = jnp.stack([inps, elu(inps), elu(-inps)], axis=-1)
    x = stacked.reshape(inps.shape[:-1] + (3 * inps.shape[-1],))
    act = lambda v: _gelu(v, approximate_gelu)
    h1 = act(x @ w1.T + b1)
    f = jnp.concatenate([features, h1], axis=-1)
    h2 = act(f @ w2.T + b2)
    return h2 @ w3.T + b3


# ------------------------------ main ----------------------------------------

if __name__ == "__main__":
    key = jax.random.PRNGKey(0)
    kp, kf, ki, kf2, ki2 = jax.random.split(key, 5)

    params = init_params(kp)
    prepared = prepare_params(params)      # one-time weight prep (hoisted)

    # Small demo shape: batch=2, seq=8, hidden=32, c_in=4.
    batch, seq = 2, 8
    features = jax.random.normal(kf, (batch, seq, HIDDEN_SIZE), jnp.float32)
    inps = jax.random.normal(ki, (batch, seq, C_IN), jnp.float32)

    # Default fast path: tanh-approx GELU + lane-dense output.
    out = jax.block_until_ready(autoreg_feedforward(features, inps, prepared))
    assert out.shape == (batch, seq, OUT3), out.shape
    ref_approx = reference(features, inps, params, approximate_gelu=True)
    np.testing.assert_allclose(np.asarray(out), np.asarray(ref_approx),
                               rtol=2e-5, atol=2e-5)

    # Exact-erf path: parity with PyTorch nn.GELU() default.
    out_exact = jax.block_until_ready(
        autoreg_feedforward(features, inps, prepared, approximate_gelu=False))
    ref_exact = reference(features, inps, params, approximate_gelu=False)
    np.testing.assert_allclose(np.asarray(out_exact), np.asarray(ref_exact),
                               rtol=2e-5, atol=2e-5)

    # Fallback (non-lane-dense) output layout must also compile and agree.
    out_fb = jax.block_until_ready(
        autoreg_feedforward(features, inps, prepared, lane_dense_out=False))
    np.testing.assert_allclose(np.asarray(out_fb), np.asarray(out),
                               rtol=1e-6, atol=1e-6)

    # Multi-step grid + ragged boundary: B=800 -> 2 steps of 512 rows
    # (second block partial), exercising the packed/partial write paths.
    features_lg = jax.random.normal(kf2, (2, 400, HIDDEN_SIZE), jnp.float32)
    inps_lg = jax.random.normal(ki2, (2, 400, C_IN), jnp.float32)
    out_lg = jax.block_until_ready(autoreg_feedforward(features_lg, inps_lg, prepared))
    ref_lg = reference(features_lg, inps_lg, params, approximate_gelu=True)
    np.testing.assert_allclose(np.asarray(out_lg), np.asarray(ref_lg),
                               rtol=2e-5, atol=3e-5)

    print("KERNEL_OK")
</pallas_src>

<mosaic_0001>
module attributes {stable_mosaic.version = 11 : i64} {
  func.func @autoreg_ff_kernel(%arg0: i32, %arg1: memref<16x4xf32, #tpu.memory_space<vmem>>, %arg2: memref<16x32xf32, #tpu.memory_space<vmem>>, %arg3: memref<9x18xf32, #tpu.memory_space<vmem>>, %arg4: memref<1x18xf32, #tpu.memory_space<vmem>>, %arg5: memref<32x64xf32, #tpu.memory_space<vmem>>, %arg6: memref<18x64xf32, #tpu.memory_space<vmem>>, %arg7: memref<1x64xf32, #tpu.memory_space<vmem>>, %arg8: memref<64x8xf32, #tpu.memory_space<vmem>>, %arg9: memref<1x8xf32, #tpu.memory_space<vmem>>, %arg10: memref<1x128xf32, #tpu.memory_space<vmem>>) attributes {dimension_semantics = [#tpu.dimension_semantics<parallel>], iteration_bounds = array<i64: 1>, scalar_prefetch = 0 : i64, scratch_operands = 0 : i64, tpu.core_type = #tpu.core_type<tc>, window_params = [{transform_indices = @transform_0, window_bounds = array<i64: 16, 4>}, {transform_indices = @transform_1, window_bounds = array<i64: 16, 32>}, {pipeline_mode = #tpu.pipeline_mode<synchronous>, transform_indices = @transform_2, window_bounds = array<i64: 9, 18>}, {pipeline_mode = #tpu.pipeline_mode<synchronous>, transform_indices = @transform_3, window_bounds = array<i64: 1, 18>}, {pipeline_mode = #tpu.pipeline_mode<synchronous>, transform_indices = @transform_4, window_bounds = array<i64: 32, 64>}, {pipeline_mode = #tpu.pipeline_mode<synchronous>, transform_indices = @transform_5, window_bounds = array<i64: 18, 64>}, {pipeline_mode = #tpu.pipeline_mode<synchronous>, transform_indices = @transform_6, window_bounds = array<i64: 1, 64>}, {pipeline_mode = #tpu.pipeline_mode<synchronous>, transform_indices = @transform_7, window_bounds = array<i64: 64, 8>}, {pipeline_mode = #tpu.pipeline_mode<synchronous>, transform_indices = @transform_8, window_bounds = array<i64: 1, 8>}, {transform_indices = @transform_9, window_bounds = array<i64: 1, 128>}]} {
    %c0 = arith.constant 0 : index
    %c0_0 = arith.constant 0 : index
    %0 = vector.load %arg1[%c0, %c0_0] : memref<16x4xf32, #tpu.memory_space<vmem>>, vector<16x3xf32>
    %c0_1 = arith.constant 0 : index
    %c0_2 = arith.constant 0 : index
    %1 = vector.load %arg2[%c0_1, %c0_2] : memref<16x32xf32, #tpu.memory_space<vmem>>, vector<16x32xf32>
    %2 = math.absf %0 : vector<16x3xf32>
    %cst = arith.constant 0.000000e+00 : f32
    %3 = vector.broadcast %cst : f32 to vector<16x3xf32>
    %4 = arith.subf %3, %2 : vector<16x3xf32>
    %5 = math.exp %4 : vector<16x3xf32>
    %cst_3 = arith.constant 1.000000e+00 : f32
    %6 = vector.broadcast %cst_3 : f32 to vector<16x3xf32>
    %7 = arith.subf %5, %6 : vector<16x3xf32>
    %cst_4 = arith.constant 0.000000e+00 : f32
    %8 = vector.broadcast %cst_4 : f32 to vector<16x3xf32>
    %9 = arith.cmpf ogt, %0, %8 : vector<16x3xf32>
    %10 = arith.select %9, %0, %7 : vector<16x3xi1>, vector<16x3xf32>
    %cst_5 = arith.constant 0.000000e+00 : f32
    %11 = vector.broadcast %cst_5 : f32 to vector<16x3xf32>
    %12 = arith.subf %11, %0 : vector<16x3xf32>
    %13 = arith.select %9, %7, %12 : vector<16x3xi1>, vector<16x3xf32>
    %14 = tpu.concatenate %0, %10, %13 in 1 : vector<16x3xf32>, vector<16x3xf32>, vector<16x3xf32> -> vector<16x9xf32>
    %c0_6 = arith.constant 0 : index
    %c0_7 = arith.constant 0 : index
    %15 = vector.load %arg3[%c0_6, %c0_7] : memref<9x18xf32, #tpu.memory_space<vmem>>, vector<9x18xf32>
    %cst_8 = arith.constant dense<0.000000e+00> : vector<16x18xf32>
    %16 = tpu.matmul %14, %15, %cst_8 {dimension_numbers = #tpu.dot_dimension_numbers<[1], [0], [0], [1], [0, 0, 1, 1], [], []>} : vector<16x9xf32>, vector<9x18xf32>, vector<16x18xf32> -> vector<16x18xf32>
    %c0_9 = arith.constant 0 : index
    %c0_10 = arith.constant 0 : index
    %17 = vector.load %arg4[%c0_9, %c0_10] : memref<1x18xf32, #tpu.memory_space<vmem>>, vector<1x18xf32>
    %18 = vector.broadcast %17 : vector<1x18xf32> to vector<16x18xf32>
    %19 = arith.addf %16, %18 : vector<16x18xf32>
    %cst_11 = arith.constant 5.000000e-01 : f32
    %20 = vector.broadcast %cst_11 : f32 to vector<16x18xf32>
    %21 = arith.mulf %20, %19 : vector<16x18xf32>
    %cst_12 = arith.constant 4.471500e-02 : f32
    %22 = vector.broadcast %cst_12 : f32 to vector<16x18xf32>
    %23 = arith.mulf %22, %19 : vector<16x18xf32>
    %24 = arith.mulf %23, %19 : vector<16x18xf32>
    %25 = arith.mulf %24, %19 : vector<16x18xf32>
    %26 = arith.addf %19, %25 : vector<16x18xf32>
    %cst_13 = arith.constant 0.797884583 : f32
    %27 = vector.broadcast %cst_13 : f32 to vector<16x18xf32>
    %28 = arith.mulf %27, %26 : vector<16x18xf32>
    %29 = math.tanh %28 : vector<16x18xf32>
    %cst_14 = arith.constant 1.000000e+00 : f32
    %30 = vector.broadcast %cst_14 : f32 to vector<16x18xf32>
    %31 = arith.addf %30, %29 : vector<16x18xf32>
    %32 = arith.mulf %21, %31 : vector<16x18xf32>
    %c0_15 = arith.constant 0 : index
    %c0_16 = arith.constant 0 : index
    %33 = vector.load %arg5[%c0_15, %c0_16] : memref<32x64xf32, #tpu.memory_space<vmem>>, vector<32x64xf32>
    %cst_17 = arith.constant dense<0.000000e+00> : vector<16x64xf32>
    %34 = tpu.matmul %1, %33, %cst_17 {dimension_numbers = #tpu.dot_dimension_numbers<[1], [0], [0], [1], [0, 0, 1, 1], [], []>} : vector<16x32xf32>, vector<32x64xf32>, vector<16x64xf32> -> vector<16x64xf32>
    %c0_18 = arith.constant 0 : index
    %c0_19 = arith.constant 0 : index
    %35 = vector.load %arg6[%c0_18, %c0_19] : memref<18x64xf32, #tpu.memory_space<vmem>>, vector<18x64xf32>
    %cst_20 = arith.constant dense<0.000000e+00> : vector<16x64xf32>
    %36 = tpu.matmul %32, %35, %cst_20 {dimension_numbers = #tpu.dot_dimension_numbers<[1], [0], [0], [1], [0, 0, 1, 1], [], []>} : vector<16x18xf32>, vector<18x64xf32>, vector<16x64xf32> -> vector<16x64xf32>
    %37 = arith.addf %34, %36 : vector<16x64xf32>
    %c0_21 = arith.constant 0 : index
    %c0_22 = arith.constant 0 : index
    %38 = vector.load %arg7[%c0_21, %c0_22] : memref<1x64xf32, #tpu.memory_space<vmem>>, vector<1x64xf32>
    %39 = vector.broadcast %38 : vector<1x64xf32> to vector<16x64xf32>
    %40 = arith.addf %37, %39 : vector<16x64xf32>
    %cst_23 = arith.constant 5.000000e-01 : f32
    %41 = vector.broadcast %cst_23 : f32 to vector<16x64xf32>
    %42 = arith.mulf %41, %40 : vector<16x64xf32>
    %cst_24 = arith.constant 4.471500e-02 : f32
    %43 = vector.broadcast %cst_24 : f32 to vector<16x64xf32>
    %44 = arith.mulf %43, %40 : vector<16x64xf32>
    %45 = arith.mulf %44, %40 : vector<16x64xf32>
    %46 = arith.mulf %45, %40 : vector<16x64xf32>
    %47 = arith.addf %40, %46 : vector<16x64xf32>
    %cst_25 = arith.constant 0.797884583 : f32
    %48 = vector.broadcast %cst_25 : f32 to vector<16x64xf32>
    %49 = arith.mulf %48, %47 : vector<16x64xf32>
    %50 = math.tanh %49 : vector<16x64xf32>
    %cst_26 = arith.constant 1.000000e+00 : f32
    %51 = vector.broadcast %cst_26 : f32 to vector<16x64xf32>
    %52 = arith.addf %51, %50 : vector<16x64xf32>
    %53 = arith.mulf %42, %52 : vector<16x64xf32>
    %c0_27 = arith.constant 0 : index
    %c0_28 = arith.constant 0 : index
    %54 = vector.load %arg8[%c0_27, %c0_28] : memref<64x8xf32, #tpu.memory_space<vmem>>, vector<64x8xf32>
    %cst_29 = arith.constant dense<0.000000e+00> : vector<16x8xf32>
    %55 = tpu.matmul %53, %54, %cst_29 {dimension_numbers = #tpu.dot_dimension_numbers<[1], [0], [0], [1], [0, 0, 1, 1], [], []>} : vector<16x64xf32>, vector<64x8xf32>, vector<16x8xf32> -> vector<16x8xf32>
    %c0_30 = arith.constant 0 : index
    %c0_31 = arith.constant 0 : index
    %56 = vector.load %arg9[%c0_30, %c0_31] : memref<1x8xf32, #tpu.memory_space<vmem>>, vector<1x8xf32>
    %57 = vector.broadcast %56 : vector<1x8xf32> to vector<16x8xf32>
    %58 = arith.addf %55, %57 : vector<16x8xf32>
    %59 = vector.shape_cast %58 : vector<16x8xf32> to vector<1x128xf32>
    %c0_32 = arith.constant 0 : index
    %c0_33 = arith.constant 0 : index
    %60 = vector.load %arg10[%c0_32, %c0_33] : memref<1x128xf32, #tpu.memory_space<vmem>>, vector<1x128xf32>
    tpu.vector_store %arg10[%c0_32, %c0_33], %59 {strides = array<i32>} : memref<1x128xf32, #tpu.memory_space<vmem>>, vector<1x128xf32>,
    return
  }
  func.func @transform_0(%arg0: i32) -> (i32, i32) {
    %c0_i32 = arith.constant 0 : i32
    %c0_i32_0 = arith.constant 0 : i32
    return %arg0, %c0_i32 : i32, i32
  }
  func.func @transform_1(%arg0: i32) -> (i32, i32) {
    %c0_i32 = arith.constant 0 : i32
    %c0_i32_0 = arith.constant 0 : i32
    return %arg0, %c0_i32 : i32, i32
  }
  func.func @transform_2(%arg0: i32) -> (i32, i32) {
    %c0_i32 = arith.constant 0 : i32
    %c0_i32_0 = arith.constant 0 : i32
    %c0_i32_1 = arith.constant 0 : i32
    return %c0_i32, %c0_i32_0 : i32, i32
  }
  func.func @transform_3(%arg0: i32) -> (i32, i32) {
    %c0_i32 = arith.constant 0 : i32
    %c0_i32_0 = arith.constant 0 : i32
    %c0_i32_1 = arith.constant 0 : i32
    return %c0_i32, %c0_i32_0 : i32, i32
  }
  func.func @transform_4(%arg0: i32) -> (i32, i32) {
    %c0_i32 = arith.constant 0 : i32
    %c0_i32_0 = arith.constant 0 : i32
    %c0_i32_1 = arith.constant 0 : i32
    return %c0_i32, %c0_i32_0 : i32, i32
  }
  func.func @transform_5(%arg0: i32) -> (i32, i32) {
    %c0_i32 = arith.constant 0 : i32
    %c0_i32_0 = arith.constant 0 : i32
    %c0_i32_1 = arith.constant 0 : i32
    return %c0_i32, %c0_i32_0 : i32, i32
  }
  func.func @transform_6(%arg0: i32) -> (i32, i32) {
    %c0_i32 = arith.constant 0 : i32
    %c0_i32_0 = arith.constant 0 : i32
    %c0_i32_1 = arith.constant 0 : i32
    return %c0_i32, %c0_i32_0 : i32, i32
  }
  func.func @transform_7(%arg0: i32) -> (i32, i32) {
    %c0_i32 = arith.constant 0 : i32
    %c0_i32_0 = arith.constant 0 : i32
    %c0_i32_1 = arith.constant 0 : i32
    return %c0_i32, %c0_i32_0 : i32, i32
  }
  func.func @transform_8(%arg0: i32) -> (i32, i32) {
    %c0_i32 = arith.constant 0 : i32
    %c0_i32_0 = arith.constant 0 : i32
    %c0_i32_1 = arith.constant 0 : i32
    return %c0_i32, %c0_i32_0 : i32, i32
  }
  func.func @transform_9(%arg0: i32) -> (i32, i32) {
    %c0_i32 = arith.constant 0 : i32
    %c0_i32_0 = arith.constant 0 : i32
    return %arg0, %c0_i32 : i32, i32
  }
}

module attributes {stable_mosaic.version = 11 : i64} {
  func.func @autoreg_ff_kernel(%arg0: i32, %arg1: memref<16x4xf32, #tpu.memory_space<vmem>>, %arg2: memref<16x32xf32, #tpu.memory_space<vmem>>, %arg3: memref<9x18xf32, #tpu.memory_space<vmem>>, %arg4: memref<1x18xf32, #tpu.memory_space<vmem>>, %arg5: memref<32x64xf32, #tpu.memory_space<vmem>>, %arg6: memref<18x64xf32, #tpu.memory_space<vmem>>, %arg7: memref<1x64xf32, #tpu.memory_space<vmem>>, %arg8: memref<64x8xf32, #tpu.memory_space<vmem>>, %arg9: memref<1x8xf32, #tpu.memory_space<vmem>>, %arg10: memref<16x8xf32, #tpu.memory_space<vmem>>) attributes {dimension_semantics = [#tpu.dimension_semantics<parallel>], iteration_bounds = array<i64: 1>, scalar_prefetch = 0 : i64, scratch_operands = 0 : i64, tpu.core_type = #tpu.core_type<tc>, window_params = [{transform_indices = @transform_0, window_bounds = array<i64: 16, 4>}, {transform_indices = @transform_1, window_bounds = array<i64: 16, 32>}, {pipeline_mode = #tpu.pipeline_mode<synchronous>, transform_indices = @transform_2, window_bounds = array<i64: 9, 18>}, {pipeline_mode = #tpu.pipeline_mode<synchronous>, transform_indices = @transform_3, window_bounds = array<i64: 1, 18>}, {pipeline_mode = #tpu.pipeline_mode<synchronous>, transform_indices = @transform_4, window_bounds = array<i64: 32, 64>}, {pipeline_mode = #tpu.pipeline_mode<synchronous>, transform_indices = @transform_5, window_bounds = array<i64: 18, 64>}, {pipeline_mode = #tpu.pipeline_mode<synchronous>, transform_indices = @transform_6, window_bounds = array<i64: 1, 64>}, {pipeline_mode = #tpu.pipeline_mode<synchronous>, transform_indices = @transform_7, window_bounds = array<i64: 64, 8>}, {pipeline_mode = #tpu.pipeline_mode<synchronous>, transform_indices = @transform_8, window_bounds = array<i64: 1, 8>}, {transform_indices = @transform_9, window_bounds = array<i64: 16, 8>}]} {
    %c0 = arith.constant 0 : index
    %c0_0 = arith.constant 0 : index
    %0 = vector.load %arg1[%c0, %c0_0] : memref<16x4xf32, #tpu.memory_space<vmem>>, vector<16x3xf32>
    %c0_1 = arith.constant 0 : index
    %c0_2 = arith.constant 0 : index
    %1 = vector.load %arg2[%c0_1, %c0_2] : memref<16x32xf32, #tpu.memory_space<vmem>>, vector<16x32xf32>
    %2 = math.absf %0 : vector<16x3xf32>
    %cst = arith.constant 0.000000e+00 : f32
    %3 = vector.broadcast %cst : f32 to vector<16x3xf32>
    %4 = arith.subf %3, %2 : vector<16x3xf32>
    %5 = math.exp %4 : vector<16x3xf32>
    %cst_3 = arith.constant 1.000000e+00 : f32
    %6 = vector.broadcast %cst_3 : f32 to vector<16x3xf32>
    %7 = arith.subf %5, %6 : vector<16x3xf32>
    %cst_4 = arith.constant 0.000000e+00 : f32
    %8 = vector.broadcast %cst_4 : f32 to vector<16x3xf32>
    %9 = arith.cmpf ogt, %0, %8 : vector<16x3xf32>
    %10 = arith.select %9, %0, %7 : vector<16x3xi1>, vector<16x3xf32>
    %cst_5 = arith.constant 0.000000e+00 : f32
    %11 = vector.broadcast %cst_5 : f32 to vector<16x3xf32>
    %12 = arith.subf %11, %0 : vector<16x3xf32>
    %13 = arith.select %9, %7, %12 : vector<16x3xi1>, vector<16x3xf32>
    %14 = tpu.concatenate %0, %10, %13 in 1 : vector<16x3xf32>, vector<16x3xf32>, vector<16x3xf32> -> vector<16x9xf32>
    %c0_6 = arith.constant 0 : index
    %c0_7 = arith.constant 0 : index
    %15 = vector.load %arg3[%c0_6, %c0_7] : memref<9x18xf32, #tpu.memory_space<vmem>>, vector<9x18xf32>
    %cst_8 = arith.constant dense<0.000000e+00> : vector<16x18xf32>
    %16 = tpu.matmul %14, %15, %cst_8 {dimension_numbers = #tpu.dot_dimension_numbers<[1], [0], [0], [1], [0, 0, 1, 1], [], []>} : vector<16x9xf32>, vector<9x18xf32>, vector<16x18xf32> -> vector<16x18xf32>
    %c0_9 = arith.constant 0 : index
    %c0_10 = arith.constant 0 : index
    %17 = vector.load %arg4[%c0_9, %c0_10] : memref<1x18xf32, #tpu.memory_space<vmem>>, vector<1x18xf32>
    %18 = vector.broadcast %17 : vector<1x18xf32> to vector<16x18xf32>
    %19 = arith.addf %16, %18 : vector<16x18xf32>
    %cst_11 = arith.constant 5.000000e-01 : f32
    %20 = vector.broadcast %cst_11 : f32 to vector<16x18xf32>
    %21 = arith.mulf %20, %19 : vector<16x18xf32>
    %cst_12 = arith.constant 4.471500e-02 : f32
    %22 = vector.broadcast %cst_12 : f32 to vector<16x18xf32>
    %23 = arith.mulf %22, %19 : vector<16x18xf32>
    %24 = arith.mulf %23, %19 : vector<16x18xf32>
    %25 = arith.mulf %24, %19 : vector<16x18xf32>
    %26 = arith.addf %19, %25 : vector<16x18xf32>
    %cst_13 = arith.constant 0.797884583 : f32
    %27 = vector.broadcast %cst_13 : f32 to vector<16x18xf32>
    %28 = arith.mulf %27, %26 : vector<16x18xf32>
    %29 = math.tanh %28 : vector<16x18xf32>
    %cst_14 = arith.constant 1.000000e+00 : f32
    %30 = vector.broadcast %cst_14 : f32 to vector<16x18xf32>
    %31 = arith.addf %30, %29 : vector<16x18xf32>
    %32 = arith.mulf %21, %31 : vector<16x18xf32>
    %c0_15 = arith.constant 0 : index
    %c0_16 = arith.constant 0 : index
    %33 = vector.load %arg5[%c0_15, %c0_16] : memref<32x64xf32, #tpu.memory_space<vmem>>, vector<32x64xf32>
    %cst_17 = arith.constant dense<0.000000e+00> : vector<16x64xf32>
    %34 = tpu.matmul %1, %33, %cst_17 {dimension_numbers = #tpu.dot_dimension_numbers<[1], [0], [0], [1], [0, 0, 1, 1], [], []>} : vector<16x32xf32>, vector<32x64xf32>, vector<16x64xf32> -> vector<16x64xf32>
    %c0_18 = arith.constant 0 : index
    %c0_19 = arith.constant 0 : index
    %35 = vector.load %arg6[%c0_18, %c0_19] : memref<18x64xf32, #tpu.memory_space<vmem>>, vector<18x64xf32>
    %cst_20 = arith.constant dense<0.000000e+00> : vector<16x64xf32>
    %36 = tpu.matmul %32, %35, %cst_20 {dimension_numbers = #tpu.dot_dimension_numbers<[1], [0], [0], [1], [0, 0, 1, 1], [], []>} : vector<16x18xf32>, vector<18x64xf32>, vector<16x64xf32> -> vector<16x64xf32>
    %37 = arith.addf %34, %36 : vector<16x64xf32>
    %c0_21 = arith.constant 0 : index
    %c0_22 = arith.constant 0 : index
    %38 = vector.load %arg7[%c0_21, %c0_22] : memref<1x64xf32, #tpu.memory_space<vmem>>, vector<1x64xf32>
    %39 = vector.broadcast %38 : vector<1x64xf32> to vector<16x64xf32>
    %40 = arith.addf %37, %39 : vector<16x64xf32>
    %cst_23 = arith.constant 5.000000e-01 : f32
    %41 = vector.broadcast %cst_23 : f32 to vector<16x64xf32>
    %42 = arith.mulf %41, %40 : vector<16x64xf32>
    %cst_24 = arith.constant 4.471500e-02 : f32
    %43 = vector.broadcast %cst_24 : f32 to vector<16x64xf32>
    %44 = arith.mulf %43, %40 : vector<16x64xf32>
    %45 = arith.mulf %44, %40 : vector<16x64xf32>
    %46 = arith.mulf %45, %40 : vector<16x64xf32>
    %47 = arith.addf %40, %46 : vector<16x64xf32>
    %cst_25 = arith.constant 0.797884583 : f32
    %48 = vector.broadcast %cst_25 : f32 to vector<16x64xf32>
    %49 = arith.mulf %48, %47 : vector<16x64xf32>
    %50 = math.tanh %49 : vector<16x64xf32>
    %cst_26 = arith.constant 1.000000e+00 : f32
    %51 = vector.broadcast %cst_26 : f32 to vector<16x64xf32>
    %52 = arith.addf %51, %50 : vector<16x64xf32>
    %53 = arith.mulf %42, %52 : vector<16x64xf32>
    %c0_27 = arith.constant 0 : index
    %c0_28 = arith.constant 0 : index
    %54 = vector.load %arg8[%c0_27, %c0_28] : memref<64x8xf32, #tpu.memory_space<vmem>>, vector<64x8xf32>
    %cst_29 = arith.constant dense<0.000000e+00> : vector<16x8xf32>
    %55 = tpu.matmul %53, %54, %cst_29 {dimension_numbers = #tpu.dot_dimension_numbers<[1], [0], [0], [1], [0, 0, 1, 1], [], []>} : vector<16x64xf32>, vector<64x8xf32>, vector<16x8xf32> -> vector<16x8xf32>
    %c0_30 = arith.constant 0 : index
    %c0_31 = arith.constant 0 : index
    %56 = vector.load %arg9[%c0_30, %c0_31] : memref<1x8xf32, #tpu.memory_space<vmem>>, vector<1x8xf32>
    %57 = vector.broadcast %56 : vector<1x8xf32> to vector<16x8xf32>
    %58 = arith.addf %55, %57 : vector<16x8xf32>
    %c0_32 = arith.constant 0 : index
    %c0_33 = arith.constant 0 : index
    %59 = vector.load %arg10[%c0_32, %c0_33] : memref<16x8xf32, #tpu.memory_space<vmem>>, vector<16x8xf32>
    tpu.vector_store %arg10[%c0_32, %c0_33], %58 {strides = array<i32>} : memref<16x8xf32, #tpu.memory_space<vmem>>, vector<16x8xf32>,
    return
  }
  func.func @transform_0(%arg0: i32) -> (i32, i32) {
    %c0_i32 = arith.constant 0 : i32
    %c0_i32_0 = arith.constant 0 : i32
    return %arg0, %c0_i32 : i32, i32
  }
  func.func @transform_1(%arg0: i32) -> (i32, i32) {
    %c0_i32 = arith.constant 0 : i32
    %c0_i32_0 = arith.constant 0 : i32
    return %arg0, %c0_i32 : i32, i32
  }
  func.func @transform_2(%arg0: i32) -> (i32, i32) {
    %c0_i32 = arith.constant 0 : i32
    %c0_i32_0 = arith.constant 0 : i32
    %c0_i32_1 = arith.constant 0 : i32
    return %c0_i32, %c0_i32_0 : i32, i32
  }
  func.func @transform_3(%arg0: i32) -> (i32, i32) {
    %c0_i32 = arith.constant 0 : i32
    %c0_i32_0 = arith.constant 0 : i32
    %c0_i32_1 = arith.constant 0 : i32
    return %c0_i32, %c0_i32_0 : i32, i32
  }
  func.func @transform_4(%arg0: i32) -> (i32, i32) {
    %c0_i32 = arith.constant 0 : i32
    %c0_i32_0 = arith.constant 0 : i32
    %c0_i32_1 = arith.constant 0 : i32
    return %c0_i32, %c0_i32_0 : i32, i32
  }
  func.func @transform_5(%arg0: i32) -> (i32, i32) {
    %c0_i32 = arith.constant 0 : i32
    %c0_i32_0 = arith.constant 0 : i32
    %c0_i32_1 = arith.constant 0 : i32
    return %c0_i32, %c0_i32_0 : i32, i32
  }
  func.func @transform_6(%arg0: i32) -> (i32, i32) {
    %c0_i32 = arith.constant 0 : i32
    %c0_i32_0 = arith.constant 0 : i32
    %c0_i32_1 = arith.constant 0 : i32
    return %c0_i32, %c0_i32_0 : i32, i32
  }
  func.func @transform_7(%arg0: i32) -> (i32, i32) {
    %c0_i32 = arith.constant 0 : i32
    %c0_i32_0 = arith.constant 0 : i32
    %c0_i32_1 = arith.constant 0 : i32
    return %c0_i32, %c0_i32_0 : i32, i32
  }
  func.func @transform_8(%arg0: i32) -> (i32, i32) {
    %c0_i32 = arith.constant 0 : i32
    %c0_i32_0 = arith.constant 0 : i32
    %c0_i32_1 = arith.constant 0 : i32
    return %c0_i32, %c0_i32_0 : i32, i32
  }
  func.func @transform_9(%arg0: i32) -> (i32, i32) {
    %c0_i32 = arith.constant 0 : i32
    %c0_i32_0 = arith.constant 0 : i32
    return %arg0, %c0_i32 : i32, i32
  }
}

</mosaic_0001>

<bundles_post_ra>
// kernel: tpu_custom_call.1
= control target key start
LH: loop header
LB: loop body
LE: loop exit
PB: predicated region body
PF: predicated region fallthrough
CT: control target
= control target key end

     0   :  { %vm92_vm0 = vcmask 1040384   ;;  %vm632_vm1 = vmmov 1   ;;  %vm70_vm5 = vcmask 23552   ;;  %vm73_vm6 = vcmask 48128   ;;  %s763_s0 = inlined_call_operand.vmem [shape: f32[16,4], index: 0, kind: input, shape index: {}]   ;;  %s764_s2 = inlined_call_operand.vmem [shape: f32[9,18], index: 2, kind: input, shape index: {}]   ;;  %s765_s5 = inlined_call_operand.vmem [shape: f32[18,64], index: 5, kind: input, shape index: {}]   ;;  %s766_s4 = inlined_call_operand.vmem [shape: f32[32,64], index: 4, kind: input, shape index: {}]   ;;  %s767_s3 = inlined_call_operand.vmem [shape: f32[1,18], index: 3, kind: input, shape index: {}]   ;;  %s768_s1 = inlined_call_operand.vmem [shape: f32[16,32], index: 1, kind: input, shape index: {}]   ;;  %s769_s7 = inlined_call_operand.vmem [shape: f32[64,8], index: 7, kind: input, shape index: {}]   ;;  %s770_s6 = inlined_call_operand.vmem [shape: f32[1,64], index: 6, kind: input, shape index: {}]   ;;  %s771_s8 = inlined_call_operand.vmem [shape: f32[1,8], index: 8, kind: input, shape index: {}]   ;;  %s772_s9 = inlined_call_operand.vmem [shape: f32[16,8], index: 9, kind: output, shape index: {}]  }
   0x1   :  { %v32_v0 = vld [vmem:[%s763_s0] sm:$0xff]  ;;  %v33_v1 = vld [vmem:[%s763_s0 + $0x8] sm:$0xff]  ;;  %vm582_vm2 = vmpackc.low %vm92_vm0, %vm632_vm1  ;;  %s633_s0 = smov 3   ;;  %vm85_vm7 = vcmask 72704   ;;  %vm203_vm8 = vcmask 1041408   ;;  %vm196_vm9 = vcmask 146432  }
   0x2   :  { %v36_v2 = vand.u32 2147483647, %v32_v0  ;;  %v37_v3 = vand.u32 2147483647, %v33_v1  ;;  %v76_v8 = vld [vmem:[%s764_s2] sm:$0xff]  ;;  %v50_v11 = vsub.f32 0.0, %v32_v0 }
   0x3   :  { %v77_v9 = vld [vmem:[%s764_s2 + $0x8] sm:$0x1]  ;;  %vm46_vm3 = vcmp.gt.f32.partialorder %v32_v0, 0.0  ;;  %v51_v15 = vsub.f32 0.0, %v33_v1  ;;  %vm47_vm4 = vcmp.gt.f32.partialorder %v33_v1, 0.0  ;;  %s634_s2 = smov 6  }
   0x4   :  { %v38_v4 = vsub.f32 0.0, %v36_v2  ;;  %v39_v5 = vsub.f32 0.0, %v37_v3  ;;  %v581_v10 = vpack.c.bf16 %v77_v9, %v76_v8  ;;  %v193_v29 = vld [vmem:[%s765_s5] sm:$0xff]  ;;  %v194_v30 = vld [vmem:[%s765_s5 + $0x8] sm:$0xff]  ;;  %v195_v32 = vld [vmem:[%s765_s5 + $0x10] sm:$0x3] }
   0x5   :  { %v587_v31 = vpack.c.bf16 %v194_v30, %v193_v29  ;;  %v189_v33 = vld [vmem:[%s766_s4] sm:$0xff]  ;;  %v190_v34 = vld [vmem:[%s766_s4 + $0x8] sm:$0xff]  ;;  %v191_v56 = vld [vmem:[%s766_s4 + $0x10] sm:$0xff]  ;;  %vm282_vm10 = vcmask 261120   ;;  %vm406_vm11 = vcmask 523264   ;;  %vm488_vm12 = vcmask 64512  }
   0x6   :  { %v40_v6 = vmul.f32 1.442695, %v38_v4  ;;  %v42_v7 = vmul.f32 1.442695, %v39_v5  ;;  %583 = vmatprep.subr.msk.bf16.mxu1 %vm582_vm2, %v581_v10  ;;  %v591_v35 = vpack.c.bf16 %v190_v34, %v189_v33  ;;  %v497_v36 = vld [vmem:[%s767_s3] ss:$0 sm:$0xff] }
   0x7   :  { %586 = vmatpush3.bf16.msk.msra.mxu1 %vm582_vm2, %v581_v10  ;;  %v192_v57 = vld [vmem:[%s766_s4 + $0x18] sm:$0xff]  ;;  %v34_v62 = vld [vmem:[%s768_s1] sm:$0xff]  ;;  %v35_v63 = vld [vmem:[%s768_s1 + $0x8] sm:$0xff] }
   0x8   :  { %620 = vpow2.f32 %v40_v6  ;;  %588 = vmatprep.subr.bf16.mxu1 %v587_v31  ;;  %v595_v61 = vpack.c.bf16 %v192_v57, %v191_v56  ;;  %v393_v2 = vld [vmem:[%s769_s7 + $0x10] sm:$0xff]  ;;  %v394_v4 = vld [vmem:[%s769_s7 + $0x18] sm:$0xff]  ;;  %v395_v6 = vld [vmem:[%s769_s7 + $0x20] sm:$0xff] }
   0x9   :  { %622 = vpow2.f32 %v42_v7  ;;  %v603_v5 = vpack.c.bf16 %v394_v4, %v393_v2  ;;  %v396_v7 = vld [vmem:[%s769_s7 + $0x28] sm:$0xff]  ;;  %v397_v9 = vld [vmem:[%s769_s7 + $0x30] sm:$0xff]  ;;  %v398_v10 = vld [vmem:[%s769_s7 + $0x38] sm:$0xff] }
   0xa   :  { %v607_v8 = vpack.c.bf16 %v396_v7, %v395_v6 }
  0x12   :  { %v621_v12 = vpop.eup %620 }
  0x13   :  { %v623_v13 = vpop.eup %622  ;;  %v495_v14 = vadd.f32 -1.0, %v621_v12  ;;  %v506_v12 = vld [vmem:[%s770_s6] ss:$0 sm:$0xff] }
  0x14   :  { %v496_v16 = vadd.f32 -1.0, %v623_v13 }
  0x15   :  { %v48_v17 = vsel %vm46_vm3, %v32_v0, %v495_v14  ;;  %v52_v18 = vsel %vm46_vm3, %v495_v14, %v50_v11  ;;  %v611_v11 = vpack.c.bf16 %v398_v10, %v397_v9 }
  0x16   :  { %56 = vrot.lane.b32.xlu0 %v48_v17, %s633_s0  ;;  %64 = vrot.lane.b32.xlu1 %v52_v18, %s634_s2  ;;  %v49_v19 = vsel %vm47_vm4, %v33_v1, %v496_v16  ;;  %v53_v20 = vsel %vm47_vm4, %v496_v16, %v51_v15 }
  0x1a   :  { %58 = vrot.lane.b32.xlu0 %v49_v19, %s633_s0  ;;  %66 = vrot.lane.b32.xlu1 %v53_v20, %s634_s2 }
  0x88   :  { %v57_v21 = vpop.permute.xlu0 %56  ;;  %v65_v22 = vpop.permute.xlu1 %64 }
  0x89   :  { %v71_v23 = vsel %vm70_vm5, %v32_v0, %v57_v21  ;;  %v391_v0 = vld [vmem:[%s769_s7] sm:$0xff] }
  0x8a   :  { %v74_v24 = vsel %vm73_vm6, %v71_v23, %v65_v22 }
  0x8b   :  { %539 = vmatprep.mubr.msk.f32.mxu1 %vm85_vm7, %v74_v24 }
  0x8c   :  { %v59_v25 = vpop.permute.xlu0 %58  ;;  %v67_v26 = vpop.permute.xlu1 %66 }
  0x8d   :  { %v72_v27 = vsel %vm70_vm5, %v33_v1, %v59_v25  ;;  %v392_v1 = vld [vmem:[%s769_s7 + $0x8] sm:$0xff] }
  0x8e   :  { %v75_v28 = vsel %vm73_vm6, %v72_v27, %v67_v26  ;;  %v599_v3 = vpack.c.bf16 %v392_v1, %v391_v0 }
  0x8f   :  { %540 = vmatmul.mubr.msk.f32.vlgmr.msra.gmra.mrb[0].mxu1 %vm85_vm7, %v75_v28 }
  0x90   :  { %590 = vmatpush3.bf16.msra.mxu1 %v587_v31  ;;  %600 = vmatprep.subr.bf16.mxu0 %v599_v3 }
  0x91   :  { %546 = vmatprep.subr.msk.mxu1 %vm203_vm8, %v195_v32  ;;  %602 = vmatpush3.bf16.msra.mxu0 %v599_v3 }
  0x92   :  { %604 = vmatprep.subr.bf16.mxu0 %v603_v5 }
  0x94   :  { %547 = vmatpush3.msk.msra.mxu1 %vm203_vm8, %v195_v32 }
  0x95   :  { %592 = vmatprep.subr.bf16.mxu1 %v591_v35  ;;  %606 = vmatpush3.bf16.msra.mxu0 %v603_v5 }
  0x96   :  { %608 = vmatprep.subr.bf16.mxu0 %v607_v8 }
  0x99   :  { %610 = vmatpush3.bf16.msra.mxu0 %v607_v8 }
  0x9a   :  { %612 = vmatprep.subr.bf16.mxu0 %v611_v11 }
  0x9d   :  { %614 = vmatpush3.bf16.msra.mxu0 %v611_v11 }
 0x162   :  { %v541_v37 = vpop.f32.mrb[0].mxu1 }
 0x163   :  { %v168_v38 = vadd.f32 %v541_v37, %v497_v36  ;;  %v162_v39 = vpop.f32.mrb[1].mxu1 }
 0x164   :  { %v163_v40 = vadd.f32 %v497_v36, %v162_v39 }
 0x165   :  { %v174_v41 = vmul.f32 0.044715, %v168_v38  ;;  %v172_v58 = vmul.f32 0.5, %v168_v38 }
 0x166   :  { %v173_v42 = vmul.f32 0.044715, %v163_v40  ;;  %v171_v54 = vmul.f32 0.5, %v163_v40 }
 0x167   :  { %v176_v43 = vmul.f32 %v174_v41, %v168_v38 }
 0x168   :  { %v175_v44 = vmul.f32 %v173_v42, %v163_v40 }
 0x169   :  { %v178_v45 = vmul.f32 %v176_v43, %v168_v38 }
 0x16a   :  { %v177_v46 = vmul.f32 %v175_v44, %v163_v40 }
 0x16b   :  { %v180_v47 = vadd.f32 %v178_v45, %v168_v38 }
 0x16c   :  { %v179_v48 = vadd.f32 %v177_v46, %v163_v40 }
 0x16d   :  { %v182_v49 = vmul.f32 0.7978846, %v180_v47 }
 0x16e   :  { %v181_v50 = vmul.f32 0.7978846, %v179_v48 }
 0x16f   :  { %624 = vtanh.f32 %v182_v49 }
 0x170   :  { %626 = vtanh.f32 %v181_v50 }
 0x179   :  { %v625_v51 = vpop.eup %624 }
 0x17a   :  { %v627_v52 = vpop.eup %626  ;;  %v186_v53 = vadd.f32 1.0, %v625_v51 }
 0x17b   :  { %v185_v55 = vadd.f32 1.0, %v627_v52 }
 0x17c   :  { %v188_v60 = vmul.f32 %v186_v53, %v172_v58 }
 0x17d   :  { %v187_v59 = vmul.f32 %v185_v55, %v171_v54 }
 0x17f   :  { %548 = vmatprep.mubr.msk.f32.mxu1 %vm196_vm9, %v187_v59 }
 0x180   :  { %549 = vmatmul.mubr.msk.f32.vlgmr.msra.gmra.mrb[2].mxu1 %vm196_vm9, %v188_v60 }
 0x181   :  { %594 = vmatpush3.bf16.msra.mxu1 %v591_v35  ;;  %559 = vmatprep.mubr.msk.f32.mxu1 %vm282_vm10, %v34_v62  ;;  %v507_v35 = vld [vmem:[%s771_s8] ss:$0 sm:$0xff] }
 0x182   :  { %596 = vmatprep.subr.bf16.mxu1 %v595_v61 }
 0x185   :  { %598 = vmatpush3.bf16.msra.mxu1 %v595_v61 }
 0x188   :  { %560 = vmatmul.mubr.msk.f32.vlgmr.msra.gmra.mrb[2].mxu1 %vm282_vm10, %v35_v63 }
 0x25b   :  { %v561_v13 = vpop.f32.mrb[2].mxu1 }
 0x25c   :  { %v372_v14 = vadd.f32 %v561_v13, %v506_v12  ;;  %v355_v15 = vpop.f32.mrb[3].mxu1 }
 0x25d   :  { %v371_v16 = vadd.f32 %v506_v12, %v355_v15 }
 0x25e   :  { %v376_v17 = vmul.f32 0.044715, %v372_v14  ;;  %v374_v32 = vmul.f32 0.5, %v372_v14 }
 0x25f   :  { %v375_v18 = vmul.f32 0.044715, %v371_v16  ;;  %v373_v30 = vmul.f32 0.5, %v371_v16 }
 0x260   :  { %v378_v19 = vmul.f32 %v376_v17, %v372_v14 }
 0x261   :  { %v377_v20 = vmul.f32 %v375_v18, %v371_v16 }
 0x262   :  { %v380_v21 = vmul.f32 %v378_v19, %v372_v14 }
 0x263   :  { %v379_v22 = vmul.f32 %v377_v20, %v371_v16 }
 0x264   :  { %v382_v23 = vadd.f32 %v380_v21, %v372_v14 }
 0x265   :  { %v381_v24 = vadd.f32 %v379_v22, %v371_v16 }
 0x266   :  { %v384_v25 = vmul.f32 0.7978846, %v382_v23 }
 0x267   :  { %v383_v26 = vmul.f32 0.7978846, %v381_v24 }
 0x268   :  { %628 = vtanh.f32 %v384_v25 }
 0x269   :  { %630 = vtanh.f32 %v383_v26 }
 0x272   :  { %v629_v27 = vpop.eup %628 }
 0x273   :  { %v631_v28 = vpop.eup %630  ;;  %v388_v29 = vadd.f32 1.0, %v629_v27 }
 0x274   :  { %v387_v31 = vadd.f32 1.0, %v631_v28 }
 0x275   :  { %v390_v34 = vmul.f32 %v388_v29, %v374_v32 }
 0x276   :  { %v389_v33 = vmul.f32 %v387_v31, %v373_v30 }
 0x278   :  { %578 = vmatprep.mubr.msk.f32.mxu0 %vm406_vm11, %v389_v33 }
 0x279   :  { %579 = vmatmul.mubr.msk.f32.vlgmr.msra.gmra.mrb[0].mxu0 %vm406_vm11, %v390_v34 }
 0x34c   :  { %v580_v36 = vpop.f32.mrb[0].mxu0 }
 0x34d   :  { %v485_v37 = vadd.f32 %v580_v36, %v507_v35  ;;  %v479_v38 = vpop.f32.mrb[1].mxu0 }
 0x34e   :  { %v480_v39 = vadd.f32 %v507_v35, %v479_v38 }
 0x34f   :  { %490 = vst.msk [vmem:[%s772_s9 + $0x8] sm:$0xff] %vm488_vm12, %v485_v37 }
 0x350   :  { %489 = vst.msk [vmem:[%s772_s9] sm:$0xff] %vm488_vm12, %v480_v39 }

</bundles_post_ra>
